<compile_context>
chip_gen: v6e
topology: v6e:2x2x1
jax: 0.10.0
libtpu: 0.0.40
codegen_flags: <defaults>
</compile_context>

<pallas_src>
import functools

import jax
import jax.numpy as jnp
from jax import lax
from jax.experimental import pallas as pl
from jax.experimental.pallas import tpu as pltpu

Y_POW = 2          # module default (hard-coded below as y*y)
LOG_SCALE = 1.0
EPS = 1e-15
GAMMA = 2.0        # module hard-codes gamma=2 (hard-coded below as d*d)

# Row order of the partial sums in the (8, tile_b) accumulator and the
# (splits*8, 1) kernel output:
#   0: focal  1: nom  2: a0  3: a1  4: a2  5: b0  6: b1  7: b2
_NUM_MOMENTS = 8


def _round_up(x, m):
    return (x + m - 1) // m * m


def hybrid_cappa_kernel(x_ref, t_ref, out_ref, acc_ref, *, num_valid,
                        tiles_per_split):
    split = pl.program_id(0)            # "parallel" axis (2 TCs on v7x)
    it = pl.program_id(1)               # "arbitrary" batch-reduction axis

    @pl.when(it == 0)
    def _init():
        acc_ref[...] = jnp.zeros_like(acc_ref)

    x = x_ref[...].astype(jnp.float32)                   # [C, Tb]
    C, Tb = x.shape

    # Logical tile index.  The index_map clamps the DMA for phantom tiles, but
    # here we keep the UNCLAMPED index so the mask kills their contribution.
    tile = split * tiles_per_split + it
    col = tile * Tb + lax.broadcasted_iota(jnp.int32, (1, Tb), 1)
    valid = col < num_valid                              # [1, Tb]
    mask = valid.astype(jnp.float32)

    # Neutralize undefined tail/phantom data BEFORE any transcendental math
    # (partial last block is never padded on the host side).
    x = jnp.where(valid, x, 0.0)
    tgt = jnp.where(valid, t_ref[...], 0)                # [1, Tb] int32

    cls = lax.broadcasted_iota(jnp.int32, (C, Tb), 0)    # class id per sublane
    t_onehot = (cls == tgt).astype(jnp.float32)          # [C, Tb]

    # ---- sigmoid focal loss (alpha=None, gamma=2), stable BCE-with-logits ----
    # pt = exp(-bce) recovered from sigmoid(x) via e = exp(-|x|): only one exp
    # and one log1p hit the EUP per element (instead of two exps + log1p).
    e = jnp.exp(-jnp.abs(x))
    bce = jnp.maximum(x, 0.0) - x * t_onehot + jnp.log1p(e)
    s_pos = 1.0 / (1.0 + e)                              # sigmoid(|x|)
    p = jnp.where(x >= 0.0, s_pos, 1.0 - s_pos)          # sigmoid(x)
    pt = t_onehot * p + (1.0 - t_onehot) * (1.0 - p)
    d = 1.0 - pt                                         # explicit square below
    focal_col = jnp.sum(d * d * bce, axis=0, keepdims=True) * mask      # [1,Tb]

    # ---- softmax over classes (sublane axis) ----
    m = jnp.max(x, axis=0, keepdims=True)
    ex = jnp.exp(x - m)
    y = ex * (1.0 / jnp.sum(ex, axis=0, keepdims=True))                 # [C,Tb]
    pred_p = y * y                                                      # y_pow=2
    pred_norm = pred_p * (1.0 / (EPS + jnp.sum(pred_p, axis=0, keepdims=True)))
    pn = pred_norm * mask                                # mask once at [C,Tb]

    # ---- quadratic-weighted kappa moments, matmul-free ----
    clsf = cls.astype(jnp.float32)
    tgtf = tgt.astype(jnp.float32)                       # already 0 when invalid
    diff = clsf - tgtf
    nom_col = jnp.sum(pn * diff * diff, axis=0, keepdims=True)
    a0_col = jnp.sum(pn, axis=0, keepdims=True)                      # hist_a moments
    a1_col = jnp.sum(pn * clsf, axis=0, keepdims=True)
    a2_col = jnp.sum(pn * clsf * clsf, axis=0, keepdims=True)
    b0_col = mask                                                    # hist_b moments
    b1_col = tgtf
    b2_col = tgtf * tgtf

    # Single full-height accumulator update: one unmasked load/add/store per
    # vreg column instead of eight single-sublane masked RMWs.
    stacked = jnp.concatenate(
        [focal_col, nom_col, a0_col, a1_col, a2_col, b0_col, b1_col, b2_col],
        axis=0)                                          # (8, Tb)
    acc_ref[...] += stacked

    @pl.when(it == pl.num_programs(1) - 1)
    def _finalize():
        # Lane-reduce once per split; scalar finalize happens in the wrapper.
        out_ref[...] = jnp.sum(acc_ref[...], axis=1, keepdims=True)   # (8, 1)


def hybrid_cappa_loss(logits, target, *, tile_b=None, num_splits=2):
    """logits: [B, C] float (any dtype); target: [B] int class indices -> scalar loss."""
    B, C = logits.shape
    itemsize = jnp.dtype(logits.dtype).itemsize

    # Lane-dense layout: classes on sublanes, batch on lanes.  Math is done in
    # f32 in-kernel after the DMA, so bf16 logits halve HBM traffic (v5e win).
    # TODO(synk): have the upstream projection emit logits directly as [C, B]
    # (optionally bf16) so this transpose copy disappears from the HBM budget.
    xt = jnp.transpose(logits)                           # [C, B]
    tgt = target.reshape(1, B).astype(jnp.int32)         # [1, B]

    # Tile size: largest batch tile keeping (double-buffered x + tgt) plus the
    # resident (8, tb) accumulator within ~12 MiB of VMEM.
    per_col = 2 * C * itemsize + 2 * 4 + _NUM_MOMENTS * 4
    if tile_b is None:
        tile_b = max(512, min(12 * 1024 * 1024 // per_col, 131072))
    tb = max(128, (int(tile_b) // 128) * 128)
    tb = min(tb, _round_up(B, 128))

    # No wrapper-side padding: the (possibly partial) last block is masked in
    # the kernel; a fully out-of-range "phantom" tile (odd tile count split
    # across cores) is clamped in the index_map and masked to zero.
    total_tiles = pl.cdiv(B, tb)
    splits = max(1, min(num_splits, total_tiles))
    tiles_per_split = pl.cdiv(total_tiles, splits)
    last_tile = total_tiles - 1

    def batch_map(s, i):
        return (0, jnp.minimum(s * tiles_per_split + i, last_tile))

    kernel = functools.partial(hybrid_cappa_kernel, num_valid=B,
                               tiles_per_split=tiles_per_split)

    # Scoped-VMEM request from actual buffer sizes (+ headroom), never 64 MiB.
    vmem_limit = int(min(max(per_col * tb + (4 << 20), 8 << 20), 32 << 20))

    moments = pl.pallas_call(
        kernel,
        out_shape=jax.ShapeDtypeStruct((splits * _NUM_MOMENTS, 1), jnp.float32),
        grid_spec=pltpu.PrefetchScalarGridSpec(
            num_scalar_prefetch=0,
            grid=(splits, tiles_per_split),
            in_specs=[pl.BlockSpec((C, tb), batch_map),
                      pl.BlockSpec((1, tb), batch_map)],
            out_specs=pl.BlockSpec((_NUM_MOMENTS, 1), lambda s, i: (s, 0)),
            scratch_shapes=[pltpu.VMEM((_NUM_MOMENTS, tb), jnp.float32)],
        ),
        compiler_params=pltpu.CompilerParams(
            # outer axis: megacore split (v7x); inner batch axis: reduction.
            dimension_semantics=("parallel", "arbitrary"),
            vmem_limit_bytes=vmem_limit,
        ),
    )(xt, tgt)

    # Cheap scalar finalize on 8*splits numbers in plain JAX.  1/B is folded
    # into the b-moments so products stay O(B) (not O(B^2)) in f32.
    s = jnp.sum(moments.reshape(splits, _NUM_MOMENTS), axis=0)
    focal_s, nom_s, a0, a1, a2, b0, b1, b2 = (s[k] for k in range(_NUM_MOMENTS))
    inv_w = 1.0 / float((C - 1) ** 2)
    inv_b = 1.0 / float(B)
    focal = focal_s * inv_b
    nom = nom_s * inv_w
    denom = (a2 * (b0 * inv_b) + a0 * (b2 * inv_b) - 2.0 * a1 * (b1 * inv_b)) * inv_w
    kappa = nom / (denom + EPS)
    return kappa + LOG_SCALE * focal


def reference_loss(logits, target):
    """Pure-JAX reference mirroring the PyTorch HybridCappaLoss forward."""
    x = logits.astype(jnp.float32)
    B, C = x.shape
    t = jax.nn.one_hot(target, C, dtype=jnp.float32)

    # sigmoid_focal_loss per class (alpha=None, gamma=2, reduction='mean'), summed
    bce = jnp.maximum(x, 0.0) - x * t + jnp.log1p(jnp.exp(-jnp.abs(x)))
    pt = jnp.exp(-bce)
    focal = jnp.sum(((1.0 - pt) ** 2) * bce) / B

    # 1 + quad_kappa_loss_v2(softmax(x), one_hot, y_pow=2, eps=1e-15)
    y = jax.nn.softmax(x, axis=1)
    idx = jnp.arange(C, dtype=jnp.float32)
    w = (idx[:, None] - idx[None, :]) ** 2 / float((C - 1) ** 2)
    pred_p = y ** 2
    pred_norm = pred_p / (EPS + pred_p.sum(1, keepdims=True))
    hist_a = pred_norm.sum(0)
    hist_b = t.sum(0)
    conf = pred_norm.T @ t
    nom = jnp.sum(w * conf)
    denom = jnp.sum(w * jnp.outer(hist_a, hist_b) / B)
    kappa = nom / (denom + EPS)
    return kappa + LOG_SCALE * focal


if __name__ == "__main__":
    key = jax.random.PRNGKey(0)
    k1, k2, k3, k4, k5, k6 = jax.random.split(key, 6)

    loss_fn = jax.jit(hybrid_cappa_loss, static_argnames=("tile_b", "num_splits"))

    # Case 1: tiny batch -> single partial tile (37 < 128), no host-side pad.
    B1, C1 = 37, 5
    logits1 = jax.random.normal(k1, (B1, C1), dtype=jnp.float32)
    target1 = jax.random.randint(k2, (B1,), 0, C1, dtype=jnp.int32)
    out1 = jax.block_until_ready(loss_fn(logits1, target1))
    ref1 = jax.block_until_ready(reference_loss(logits1, target1))
    assert jnp.allclose(out1, ref1, rtol=1e-4, atol=1e-5), (out1, ref1)

    # Case 2: forced small tiles -> 3 tiles split across 2 "cores" (one
    # clamped+masked phantom tile), partial last block, resident accumulator.
    B2, C2 = 300, 5
    logits2 = jax.random.normal(k3, (B2, C2), dtype=jnp.float32)
    target2 = jax.random.randint(k4, (B2,), 0, C2, dtype=jnp.int32)
    out2 = jax.block_until_ready(loss_fn(logits2, target2, tile_b=128))
    ref2 = jax.block_until_ready(reference_loss(logits2, target2))
    assert jnp.allclose(out2, ref2, rtol=1e-4, atol=1e-5), (out2, ref2)

    # Case 3: more classes, even tile split (4 tiles / 2 splits), partial tail.
    B3, C3 = 1000, 7
    logits3 = jax.random.normal(k5, (B3, C3), dtype=jnp.float32)
    target3 = jax.random.randint(k6, (B3,), 0, C3, dtype=jnp.int32)
    out3 = jax.block_until_ready(loss_fn(logits3, target3, tile_b=256))
    ref3 = jax.block_until_ready(reference_loss(logits3, target3))
    assert jnp.allclose(out3, ref3, rtol=1e-4, atol=1e-5), (out3, ref3)

    print("KERNEL_OK")
</pallas_src>

<mosaic_0001>
module attributes {stable_mosaic.version = 11 : i64} {
  func.func @hybrid_cappa_kernel(%arg0: i32, %arg1: i32, %arg2: memref<5x128xf32, #tpu.memory_space<vmem>>, %arg3: memref<1x128xi32, #tpu.memory_space<vmem>>, %arg4: memref<8x1xf32, #tpu.memory_space<vmem>>, %arg5: memref<8x128xf32, #tpu.memory_space<vmem>>) attributes {dimension_semantics = [#tpu.dimension_semantics<parallel>, #tpu.dimension_semantics<arbitrary>], iteration_bounds = array<i64: 1, 1>, scalar_prefetch = 0 : i64, scratch_operands = 1 : i64, tpu.core_type = #tpu.core_type<tc>, window_params = [{transform_indices = @transform_0, window_bounds = array<i64: 5, 128>}, {transform_indices = @transform_1, window_bounds = array<i64: 1, 128>}, {transform_indices = @transform_2, window_bounds = array<i64: 8, 1>}]} {
    %c0_i32 = arith.constant 0 : i32
    %0 = arith.cmpi eq, %arg1, %c0_i32 : i32
    %1 = arith.extui %0 : i1 to i32
    %c0_i32_0 = arith.constant 0 : i32
    %2 = arith.cmpi ne, %1, %c0_i32_0 : i32
    scf.if %2 {
      %cst_31 = arith.constant 0.000000e+00 : f32
      %106 = vector.broadcast %cst_31 : f32 to vector<8x128xf32>
      %c0_32 = arith.constant 0 : index
      %c0_33 = arith.constant 0 : index
      %107 = vector.load %arg5[%c0_32, %c0_33] : memref<8x128xf32, #tpu.memory_space<vmem>>, vector<8x128xf32>
      tpu.vector_store %arg5[%c0_32, %c0_33], %106 {strides = array<i32>} : memref<8x128xf32, #tpu.memory_space<vmem>>, vector<8x128xf32>,
    } else {
    }
    %c0 = arith.constant 0 : index
    %c0_1 = arith.constant 0 : index
    %3 = vector.load %arg2[%c0, %c0_1] : memref<5x128xf32, #tpu.memory_space<vmem>>, vector<5x128xf32>
    %c1_i32 = arith.constant 1 : i32
    %4 = arith.muli %arg0, %c1_i32 : i32
    %5 = arith.addi %4, %arg1 : i32
    %c128_i32 = arith.constant 128 : i32
    %6 = arith.muli %5, %c128_i32 : i32
    %7 = tpu.iota {dimensions = array<i32: 1>} : vector<1x128xi32>
    %8 = vector.broadcast %6 : i32 to vector<1x128xi32>
    %9 = arith.addi %8, %7 : vector<1x128xi32>
    %c37_i32 = arith.constant 37 : i32
    %10 = vector.broadcast %c37_i32 : i32 to vector<1x128xi32>
    %11 = arith.cmpi slt, %9, %10 : vector<1x128xi32>
    %12 = arith.extui %11 : vector<1x128xi1> to vector<1x128xi32>
    %13 = arith.sitofp %12 : vector<1x128xi32> to vector<1x128xf32>
    %cst = arith.constant 0.000000e+00 : f32
    %14 = vector.shape_cast %11 : vector<1x128xi1> to vector<1x128xi1>
    %15 = vector.broadcast %14 : vector<1x128xi1> to vector<5x128xi1>
    %16 = vector.broadcast %cst : f32 to vector<5x128xf32>
    %17 = arith.select %15, %3, %16 : vector<5x128xi1>, vector<5x128xf32>
    %c0_2 = arith.constant 0 : index
    %c0_3 = arith.constant 0 : index
    %18 = vector.load %arg3[%c0_2, %c0_3] : memref<1x128xi32, #tpu.memory_space<vmem>>, vector<1x128xi32>
    %c0_i32_4 = arith.constant 0 : i32
    %19 = vector.broadcast %c0_i32_4 : i32 to vector<1x128xi32>
    %20 = arith.select %11, %18, %19 : vector<1x128xi1>, vector<1x128xi32>
    %21 = tpu.iota {dimensions = array<i32: 0>} : vector<5x128xi32>
    %22 = vector.broadcast %20 : vector<1x128xi32> to vector<5x128xi32>
    %23 = arith.cmpi eq, %21, %22 : vector<5x128xi32>
    %24 = arith.extui %23 : vector<5x128xi1> to vector<5x128xi32>
    %25 = arith.sitofp %24 : vector<5x128xi32> to vector<5x128xf32>
    %26 = math.absf %17 : vector<5x128xf32>
    %cst_5 = arith.constant 0.000000e+00 : f32
    %27 = vector.broadcast %cst_5 : f32 to vector<5x128xf32>
    %28 = arith.subf %27, %26 : vector<5x128xf32>
    %29 = math.exp %28 : vector<5x128xf32>
    %cst_6 = arith.constant 0.000000e+00 : f32
    %30 = vector.broadcast %cst_6 : f32 to vector<5x128xf32>
    %31 = arith.maximumf %17, %30 : vector<5x128xf32>
    %32 = arith.mulf %17, %25 : vector<5x128xf32>
    %33 = arith.subf %31, %32 : vector<5x128xf32>
    %34 = math.log1p %29 : vector<5x128xf32>
    %35 = arith.addf %33, %34 : vector<5x128xf32>
    %cst_7 = arith.constant 1.000000e+00 : f32
    %36 = vector.broadcast %cst_7 : f32 to vector<5x128xf32>
    %37 = arith.addf %36, %29 : vector<5x128xf32>
    %cst_8 = arith.constant 1.000000e+00 : f32
    %38 = vector.broadcast %cst_8 : f32 to vector<5x128xf32>
    %39 = arith.divf %38, %37 : vector<5x128xf32>
    %cst_9 = arith.constant 0.000000e+00 : f32
    %40 = vector.broadcast %cst_9 : f32 to vector<5x128xf32>
    %41 = arith.cmpf oge, %17, %40 : vector<5x128xf32>
    %cst_10 = arith.constant 1.000000e+00 : f32
    %42 = vector.broadcast %cst_10 : f32 to vector<5x128xf32>
    %43 = arith.subf %42, %39 : vector<5x128xf32>
    %44 = arith.select %41, %39, %43 : vector<5x128xi1>, vector<5x128xf32>
    %45 = arith.mulf %25, %44 : vector<5x128xf32>
    %cst_11 = arith.constant 1.000000e+00 : f32
    %46 = vector.broadcast %cst_11 : f32 to vector<5x128xf32>
    %47 = arith.subf %46, %25 : vector<5x128xf32>
    %cst_12 = arith.constant 1.000000e+00 : f32
    %48 = vector.broadcast %cst_12 : f32 to vector<5x128xf32>
    %49 = arith.subf %48, %44 : vector<5x128xf32>
    %50 = arith.mulf %47, %49 : vector<5x128xf32>
    %51 = arith.addf %45, %50 : vector<5x128xf32>
    %cst_13 = arith.constant 1.000000e+00 : f32
    %52 = vector.broadcast %cst_13 : f32 to vector<5x128xf32>
    %53 = arith.subf %52, %51 : vector<5x128xf32>
    %54 = arith.mulf %53, %53 : vector<5x128xf32>
    %55 = arith.mulf %54, %35 : vector<5x128xf32>
    %cst_14 = arith.constant dense<0.000000e+00> : vector<128xf32>
    %56 = vector.multi_reduction <add>, %55, %cst_14 [0] : vector<5x128xf32> to vector<128xf32>
    %57 = vector.shape_cast %56 : vector<128xf32> to vector<1x128xf32>
    %58 = arith.mulf %57, %13 : vector<1x128xf32>
    %cst_15 = arith.constant dense<0xFF800000> : vector<128xf32>
    %59 = vector.multi_reduction <maximumf>, %17, %cst_15 [0] : vector<5x128xf32> to vector<128xf32>
    %60 = vector.shape_cast %59 : vector<128xf32> to vector<1x128xf32>
    %61 = vector.broadcast %60 : vector<1x128xf32> to vector<5x128xf32>
    %62 = arith.subf %17, %61 : vector<5x128xf32>
    %63 = math.exp %62 : vector<5x128xf32>
    %cst_16 = arith.constant dense<0.000000e+00> : vector<128xf32>
    %64 = vector.multi_reduction <add>, %63, %cst_16 [0] : vector<5x128xf32> to vector<128xf32>
    %65 = vector.shape_cast %64 : vector<128xf32> to vector<1x128xf32>
    %cst_17 = arith.constant 1.000000e+00 : f32
    %66 = vector.broadcast %cst_17 : f32 to vector<1x128xf32>
    %67 = arith.divf %66, %65 : vector<1x128xf32>
    %68 = vector.broadcast %67 : vector<1x128xf32> to vector<5x128xf32>
    %69 = arith.mulf %63, %68 : vector<5x128xf32>
    %70 = arith.mulf %69, %69 : vector<5x128xf32>
    %cst_18 = arith.constant dense<0.000000e+00> : vector<128xf32>
    %71 = vector.multi_reduction <add>, %70, %cst_18 [0] : vector<5x128xf32> to vector<128xf32>
    %72 = vector.shape_cast %71 : vector<128xf32> to vector<1x128xf32>
    %cst_19 = arith.constant 1.000000e-15 : f32
    %73 = vector.broadcast %cst_19 : f32 to vector<1x128xf32>
    %74 = arith.addf %73, %72 : vector<1x128xf32>
    %cst_20 = arith.constant 1.000000e+00 : f32
    %75 = vector.broadcast %cst_20 : f32 to vector<1x128xf32>
    %76 = arith.divf %75, %74 : vector<1x128xf32>
    %77 = vector.broadcast %76 : vector<1x128xf32> to vector<5x128xf32>
    %78 = arith.mulf %70, %77 : vector<5x128xf32>
    %79 = vector.broadcast %13 : vector<1x128xf32> to vector<5x128xf32>
    %80 = arith.mulf %78, %79 : vector<5x128xf32>
    %81 = arith.sitofp %21 : vector<5x128xi32> to vector<5x128xf32>
    %82 = arith.sitofp %20 : vector<1x128xi32> to vector<1x128xf32>
    %83 = vector.broadcast %82 : vector<1x128xf32> to vector<5x128xf32>
    %84 = arith.subf %81, %83 : vector<5x128xf32>
    %85 = arith.mulf %80, %84 : vector<5x128xf32>
    %86 = arith.mulf %85, %84 : vector<5x128xf32>
    %cst_21 = arith.constant dense<0.000000e+00> : vector<128xf32>
    %87 = vector.multi_reduction <add>, %86, %cst_21 [0] : vector<5x128xf32> to vector<128xf32>
    %88 = vector.shape_cast %87 : vector<128xf32> to vector<1x128xf32>
    %cst_22 = arith.constant dense<0.000000e+00> : vector<128xf32>
    %89 = vector.multi_reduction <add>, %80, %cst_22 [0] : vector<5x128xf32> to vector<128xf32>
    %90 = vector.shape_cast %89 : vector<128xf32> to vector<1x128xf32>
    %91 = arith.mulf %80, %81 : vector<5x128xf32>
    %cst_23 = arith.constant dense<0.000000e+00> : vector<128xf32>
    %92 = vector.multi_reduction <add>, %91, %cst_23 [0] : vector<5x128xf32> to vector<128xf32>
    %93 = vector.shape_cast %92 : vector<128xf32> to vector<1x128xf32>
    %94 = arith.mulf %80, %81 : vector<5x128xf32>
    %95 = arith.mulf %94, %81 : vector<5x128xf32>
    %cst_24 = arith.constant dense<0.000000e+00> : vector<128xf32>
    %96 = vector.multi_reduction <add>, %95, %cst_24 [0] : vector<5x128xf32> to vector<128xf32>
    %97 = vector.shape_cast %96 : vector<128xf32> to vector<1x128xf32>
    %98 = arith.mulf %82, %82 : vector<1x128xf32>
    %99 = tpu.concatenate %58, %88, %90, %93, %97, %13, %82, %98 in 0 : vector<1x128xf32>, vector<1x128xf32>, vector<1x128xf32>, vector<1x128xf32>, vector<1x128xf32>, vector<1x128xf32>, vector<1x128xf32>, vector<1x128xf32> -> vector<8x128xf32>
    %c0_25 = arith.constant 0 : index
    %c0_26 = arith.constant 0 : index
    %100 = vector.load %arg5[%c0_25, %c0_26] : memref<8x128xf32, #tpu.memory_space<vmem>>, vector<8x128xf32>
    %101 = arith.addf %100, %99 : vector<8x128xf32>
    %c0_27 = arith.constant 0 : index
    %c0_28 = arith.constant 0 : index
    %102 = vector.load %arg5[%c0_27, %c0_28] : memref<8x128xf32, #tpu.memory_space<vmem>>, vector<8x128xf32>
    tpu.vector_store %arg5[%c0_27, %c0_28], %101 {strides = array<i32>} : memref<8x128xf32, #tpu.memory_space<vmem>>, vector<8x128xf32>,
    %c0_i32_29 = arith.constant 0 : i32
    %103 = arith.cmpi eq, %arg1, %c0_i32_29 : i32
    %104 = arith.extui %103 : i1 to i32
    %c0_i32_30 = arith.constant 0 : i32
    %105 = arith.cmpi ne, %104, %c0_i32_30 : i32
    scf.if %105 {
      %c0_31 = arith.constant 0 : index
      %c0_32 = arith.constant 0 : index
      %106 = vector.load %arg5[%c0_31, %c0_32] : memref<8x128xf32, #tpu.memory_space<vmem>>, vector<8x128xf32>
      %cst_33 = arith.constant dense<0.000000e+00> : vector<8xf32>
      %107 = vector.multi_reduction <add>, %106, %cst_33 [1] : vector<8x128xf32> to vector<8xf32>
      %108 = vector.shape_cast %107 : vector<8xf32> to vector<8x1xf32>
      %c0_34 = arith.constant 0 : index
      %c0_35 = arith.constant 0 : index
      %109 = vector.load %arg4[%c0_34, %c0_35] : memref<8x1xf32, #tpu.memory_space<vmem>>, vector<8x1xf32>
      tpu.vector_store %arg4[%c0_34, %c0_35], %108 {strides = array<i32>} : memref<8x1xf32, #tpu.memory_space<vmem>>, vector<8x1xf32>,
    } else {
    }
    return
  }
  func.func @transform_0(%arg0: i32, %arg1: i32) -> (i32, i32) {
    %c1_i32 = arith.constant 1 : i32
    %0 = arith.muli %arg0, %c1_i32 : i32
    %1 = arith.addi %0, %arg1 : i32
    %c0_i32 = arith.constant 0 : i32
    %2 = arith.minsi %1, %c0_i32 : i32
    %c0_i32_0 = arith.constant 0 : i32
    %c0_i32_1 = arith.constant 0 : i32
    return %c0_i32_0, %2 : i32, i32
  }
  func.func @transform_1(%arg0: i32, %arg1: i32) -> (i32, i32) {
    %c1_i32 = arith.constant 1 : i32
    %0 = arith.muli %arg0, %c1_i32 : i32
    %1 = arith.addi %0, %arg1 : i32
    %c0_i32 = arith.constant 0 : i32
    %2 = arith.minsi %1, %c0_i32 : i32
    %c0_i32_0 = arith.constant 0 : i32
    %c0_i32_1 = arith.constant 0 : i32
    return %c0_i32_0, %2 : i32, i32
  }
  func.func @transform_2(%arg0: i32, %arg1: i32) -> (i32, i32) {
    %c0_i32 = arith.constant 0 : i32
    %c0_i32_0 = arith.constant 0 : i32
    return %arg0, %c0_i32 : i32, i32
  }
}

</mosaic_0001>

<bundles_post_ra>
// kernel: hybrid_cappa_loss.1
= control target key start
LH: loop header
LB: loop body
LE: loop exit
PB: predicated region body
PF: predicated region fallthrough
CT: control target
= control target key end

     0   :  { %7 = vsyncpa [#allocation4], 0  ;;  %s274_s9 = smov [#allocation3]   ;;  %s333_s0 = inlined_call_operand.hbm [shape: f32[5,37], index: 0, kind: input, shape index: {}]   ;;  %s334_s1 = inlined_call_operand.vmem [shape: s32[1,37], index: 1, kind: input, shape index: {}]   ;;  %s335_s2 = inlined_call_operand.vmem [shape: f32[8,1], index: 2, kind: output, shape index: {}]  }
   0x1   :  { %s19_s10 = sshll.u32 %s274_s9, 4  ;;  %s20_s10 = int_to_ptr.vmem [resolvable:$true] %s19_s10 }
   0x2   :  { %s260_s11 = scalar_lea.vmem %s20_s10, 128  ;;  %p265_p1 = scmp.lt.s32.totalorder %s20_s10, %s20_s10 }
   0x3   :  { %p261_p0 = scmp.ne.s32.totalorder %s20_s10, %s260_s11  ;;  %p266_p2 = scmp.lt.s32.totalorder %s260_s11, %s260_s11 }
   0x5   :  { %p267_p3 = por %p266_p2, %p265_p1 }
   0x7   :  { %p268_p4 = pnand %p267_p3, %p261_p0 }
   0x9   :  { %271 = shalt.err (!%p268_p4)
}
   0xa   :  { %22 = dma.hbm_to_vmem [thread:$0]  %s333_s0, 128, %s20_s10, [#allocation4]  }
   0xb   :  { %272 = dma.done.wait [#allocation4], 128  }
   0xc   :  { %273 = vsyncadd [#allocation4], 4294967168  ;;  %v63_v0 = vlaneseq  ;;  %v60_v4 = vld [vmem:[#allocation3] sm:$0x1f]  ;;  %vm114_vm1 = vcmask 1044480   ;;  %v275_v16 = vmov 0.0  }
   0xd   :  { %v72_v5 = vld [vmem:[%s334_s1] sm:$0x1]  ;;  %vm202_vm5 = vcmask 1040384   ;;  %vm204_vm6 = vcmask 1041408   ;;  %vm206_vm7 = vcmask 1042432   ;;  %vm208_vm8 = vcmask 1043456  }
   0xe   :  { %v294_v1 = vand.u32 127, %v63_v0  ;;  %v75_v2 = vshrl.u32 %v63_v0, 7  ;;  %vm211_vm9 = vcmask 1045504   ;;  %vm213_vm10 = vcmask 1046528  }
   0xf   :  { %vm224_vm11 = vcmask 7168  }
  0x10   :  { %vm67_vm0 = vcmp.lt.s32.totalorder %v294_v1, 37  ;;  %v78_v3 = vsub.s32 0, %v75_v2  ;;  %v305_v11 = vcvt.s32.f32 %v75_v2 }
  0x11   :  { %v71_v6 = vsel %vm67_vm0, %v60_v4, 0.0  ;;  %v73_v7 = vsel %vm67_vm0, %v72_v5, 0 }
  0x12   :  { %v79_v8 = vrot.slane %v73_v7, %v78_v3  ;;  %v83_v9 = vand.u32 2147483647, %v71_v6  ;;  %v123_v10 = vsel %vm114_vm1, %v71_v6, -inf  ;;  %v307_v12 = vcvt.s32.f32 %v73_v7 }
  0x13   :  { %v87_v14 = vmax.f32 %v71_v6, 0.0  ;;  %v124_v15 = vrot.slane %v123_v10, 4  ;;  %vm103_vm3 = vcmp.ge.f32.partialorder %v71_v6, 0.0  ;;  %v236_v7 = vsel %vm67_vm0, 1.0, %v275_v16 }
  0x14   :  { %vm80_vm2 = vcmp.eq.s32.totalorder %v75_v2, %v79_v8  ;;  %v84_v13 = vsub.f32 0.0, %v83_v9  ;;  %v161_v18 = vrot.slane %v307_v12, %v78_v3 }
  0x15   :  { %v237_v17 = vsel %vm80_vm2, 1.0, %v275_v16  ;;  %v125_v21 = vmax.f32 %v123_v10, %v124_v15 }
  0x16   :  { %v85_v19 = vmul.f32 1.442695, %v84_v13  ;;  %v88_v20 = vmul.f32 %v237_v17, %v71_v6  ;;  %v311_v22 = vsub.f32 %v305_v11, %v161_v18  ;;  %v107_v43 = vsub.f32 1.0, %v237_v17 }
  0x17   :  { %v126_v24 = vrot.slane %v125_v21, 2 }
  0x18   :  { %240 = vpow2.f32 %v85_v19  ;;  %v89_v23 = vsub.f32 %v87_v14, %v88_v20 }
  0x19   :  { %v127_v25 = vmax.f32 %v125_v21, %v126_v24 }
  0x1b   :  { %v128_v26 = vrot.slane %v127_v25, 1 }
  0x1d   :  { %v129_v27 = vmax.f32 %v127_v25, %v128_v26 }
  0x1f   :  { %v130_v28 = vsub.f32 %v71_v6, %v129_v27 }
  0x21   :  { %v131_v29 = vmul.f32 1.442695, %v130_v28 }
  0x23   :  { %242 = vpow2.f32 %v131_v29 }
  0x25   :  { %v241_v30 = vpop.eup %240 }
  0x26   :  { %v90_v31 = vadd.f32 1.0, %v241_v30  ;;  %v93_v33 = vmul.f32 -0.5, %v241_v30  ;;  %v96_v40 = vand.u32 2147483647, %v241_v30 }
  0x28   :  { %244 = vlog2.f32 %v90_v31  ;;  %v94_v37 = vadd.f32 1.0, %v93_v33  ;;  %vm97_vm4 = vcmp.lt.f32.partialorder %v96_v40, 0.0004427343 }
  0x29   :  { %246 = vrcp.f32 %v90_v31 }
  0x2a   :  { %v95_v45 = vmul.f32 %v241_v30, %v94_v37 }
  0x30   :  { %v243_v32 = vpop.eup %242 }
  0x31   :  { %v133_v34 = vsel %vm114_vm1, %v243_v32, 0.0 }
  0x32   :  { %v134_v35 = vrot.slane %v133_v34, 4 }
  0x34   :  { %v135_v38 = vadd.f32 %v134_v35, %v133_v34 }
  0x35   :  { %v245_v36 = vpop.eup %244 }
  0x36   :  { %v247_v39 = vpop.eup %246  ;;  %v136_v42 = vrot.slane %v135_v38, 2  ;;  %v92_v44 = vmul.f32 0.6931472, %v245_v36 }
  0x37   :  { %v104_v41 = vsub.f32 1.0, %v247_v39 }
  0x38   :  { %v137_v47 = vadd.f32 %v136_v42, %v135_v38  ;;  %v98_v52 = vsel %vm97_vm4, %v95_v45, %v92_v44 }
  0x39   :  { %v105_v46 = vsel %vm103_vm3, %v247_v39, %v104_v41  ;;  %v99_v55 = vadd.f32 %v98_v52, %v89_v23 }
  0x3a   :  { %v106_v48 = vmul.f32 %v237_v17, %v105_v46  ;;  %v108_v49 = vsub.f32 1.0, %v105_v46  ;;  %v138_v50 = vrot.slane %v137_v47, 1 }
  0x3c   :  { %v109_v51 = vmul.f32 %v108_v49, %v107_v43  ;;  %v139_v53 = vadd.f32 %v138_v50, %v137_v47  ;;  %v195_v50 = vmul.f32 %v307_v12, %v307_v12 }
  0x3e   :  { %v110_v54 = vadd.f32 %v109_v51, %v106_v48  ;;  %248 = vrcp.f32 %v139_v53  ;;  %v197_v53 = vrot.slane %v307_v12, 2 }
  0x40   :  { %v111_v56 = vsub.f32 1.0, %v110_v54 }
  0x42   :  { %v112_v57 = vmul.f32 %v111_v56, %v111_v56 }
  0x44   :  { %v113_v58 = vmul.f32 %v112_v57, %v99_v55  ;;  %v200_v55 = vrot.slane %v195_v50, 1 }
  0x46   :  { %v115_v59 = vsel %vm114_vm1, %v113_v58, 0.0 }
  0x47   :  { %v116_v60 = vrot.slane %v115_v59, 4 }
  0x49   :  { %v117_v61 = vadd.f32 %v116_v60, %v115_v59 }
  0x4b   :  { %v118_v62 = vrot.slane %v117_v61, 2  ;;  %v249_v63 = vpop.eup %248 }
  0x4c   :  { %v142_v2 = vmul.f32 %v249_v63, %v243_v32 }
  0x4d   :  { %v119_v0 = vadd.f32 %v118_v62, %v117_v61 }
  0x4e   :  { %v143_v4 = vmul.f32 %v142_v2, %v142_v2 }
  0x4f   :  { %v120_v3 = vrot.slane %v119_v0, 1 }
  0x50   :  { %v144_v6 = vsel %vm114_vm1, %v143_v4, 0.0 }
  0x51   :  { %v121_v5 = vadd.f32 %v120_v3, %v119_v0  ;;  %v145_v8 = vrot.slane %v144_v6, 4 }
  0x53   :  { %v122_v9 = vmul.f32 %v236_v7, %v121_v5  ;;  %v146_v10 = vadd.f32 %v145_v8, %v144_v6 }
  0x55   :  { %v147_v13 = vrot.slane %v146_v10, 2 }
  0x57   :  { %v148_v14 = vadd.f32 %v147_v13, %v146_v10 }
  0x59   :  { %v149_v15 = vrot.slane %v148_v14, 1 }
  0x5b   :  { %v150_v17 = vadd.f32 %v149_v15, %v148_v14 }
  0x5d   :  { %v151_v18 = vadd.f32 1e-15, %v150_v17 }
  0x5f   :  { %250 = vrcp.f32 %v151_v18 }
  0x6c   :  { %v251_v19 = vpop.eup %250 }
  0x6d   :  { %v154_v20 = vmul.f32 %v251_v19, %v143_v4 }
  0x6f   :  { %v155_v21 = vmul.f32 %v236_v7, %v154_v20 }
  0x71   :  { %v163_v23 = vmul.f32 %v311_v22, %v155_v21  ;;  %v172_v24 = vsel %vm114_vm1, %v155_v21, 0.0  ;;  %v179_v25 = vmul.f32 %v305_v11, %v155_v21 }
  0x72   :  { %v173_v1 = vrot.slane %v172_v24, 4 }
  0x73   :  { %v164_v16 = vmul.f32 %v163_v23, %v311_v22  ;;  %v180_v26 = vsel %vm114_vm1, %v179_v25, 0.0  ;;  %v187_v27 = vmul.f32 %v179_v25, %v305_v11 }
  0x74   :  { %v174_v28 = vadd.f32 %v173_v1, %v172_v24  ;;  %v181_v29 = vrot.slane %v180_v26, 4 }
  0x75   :  { %v165_v30 = vsel %vm114_vm1, %v164_v16, 0.0  ;;  %v188_v31 = vsel %vm114_vm1, %v187_v27, 0.0 }
  0x76   :  { %v166_v32 = vrot.slane %v165_v30, 4  ;;  %v175_v33 = vrot.slane %v174_v28, 2  ;;  %v182_v34 = vadd.f32 %v181_v29, %v180_v26  ;;  %v189_v35 = vrot.slane %v188_v31, 4 }
  0x78   :  { %v167_v36 = vadd.f32 %v166_v32, %v165_v30  ;;  %v176_v37 = vadd.f32 %v175_v33, %v174_v28  ;;  %v183_v38 = vrot.slane %v182_v34, 2  ;;  %v190_v39 = vadd.f32 %v189_v35, %v188_v31 }
  0x7a   :  { %v168_v40 = vrot.slane %v167_v36, 2  ;;  %v184_v22 = vadd.f32 %v183_v38, %v182_v34  ;;  %v191_v41 = vrot.slane %v190_v39, 2  ;;  %v177_v42 = vrot.slane %v176_v37, 1 }
  0x7c   :  { %v169_v43 = vadd.f32 %v168_v40, %v167_v36  ;;  %v185_v11 = vrot.slane %v184_v22, 1  ;;  %v192_v44 = vadd.f32 %v191_v41, %v190_v39  ;;  %v178_v47 = vadd.f32 %v177_v42, %v176_v37 }
  0x7e   :  { %v170_v45 = vrot.slane %v169_v43, 1  ;;  %v193_v46 = vrot.slane %v192_v44, 1  ;;  %v186_v49 = vadd.f32 %v185_v11, %v184_v22 }
  0x80   :  { %v171_v48 = vadd.f32 %v170_v45, %v169_v43  ;;  %v194_v51 = vadd.f32 %v193_v46, %v192_v44 }
  0x82   :  { %v203_v52 = vsel %vm202_vm5, %v122_v9, %v171_v48 }
  0x83   :  { %v205_v54 = vsel %vm204_vm6, %v203_v52, %v178_v47 }
  0x84   :  { %v207_v56 = vsel %vm206_vm7, %v205_v54, %v186_v49 }
  0x85   :  { %v209_v57 = vsel %vm208_vm8, %v207_v56, %v194_v51 }
  0x86   :  { %v210_v58 = vsel %vm114_vm1, %v209_v57, %v236_v7 }
  0x87   :  { %v212_v59 = vsel %vm211_vm9, %v210_v58, %v197_v53 }
  0x88   :  { %v214_v60 = vsel %vm213_vm10, %v212_v59, %v200_v55 }
  0x89   :  { %222 = vadd.xlane.f32.xlu0 %v214_v60 }
 0x112   :  { %v223_v61 = vpop.xlane.xlu0 %222 }
 0x113   :  { %225 = vst.msk [vmem:[%s335_s2] sm:$0xff] %vm224_vm11, %v223_v61 }
 0x114   :  { %230 = vsyncpa [#allocation4], 1 }

</bundles_post_ra>
